<compile_context>
chip_gen: v7x
topology: tpu7x:2x2x1
jax: 0.10.0
libtpu: 0.0.40
codegen_flags: <defaults>
</compile_context>

<pallas_src>
import jax
import jax.numpy as jnp
from jax.experimental import pallas as pl
from jax.experimental.pallas import tpu as pltpu

_EPS = 1e-6


def _round_up(x, m):
    return ((x + m - 1) // m) * m


# ---------------------------------------------------------------------------
# Kernels
# ---------------------------------------------------------------------------
def _resident_kernel(x_ref, a2_ref, b2_ref, w_ref, bias_ref, o_ref):
    """LayerNorm -> dense (VMEM-resident W) -> +bias -> +residual for one row tile."""
    x = x_ref[...].astype(jnp.float32)                       # (tm, H)
    h = x.shape[-1]

    # Single-pass moments (sum / sum-of-squares): no separate `diff` tile has to
    # stay live before the reduce.  Unbiased (N-1) variance, eps added to std,
    # exactly matching the torch module.
    sum_x = jnp.sum(x, axis=-1, keepdims=True)
    sum_x2 = jnp.sum(x * x, axis=-1, keepdims=True)
    mean = sum_x * (1.0 / h)
    var_unb = jnp.maximum((sum_x2 - sum_x * mean) * (1.0 / (h - 1)), 0.0)
    inv_std = pl.reciprocal(jnp.sqrt(var_unb) + _EPS, approx=False)   # EUP, exact

    a2 = a2_ref[...].astype(jnp.float32)                     # (1, H)
    b2 = b2_ref[...].astype(jnp.float32)                     # (1, H)
    normed = ((x - mean) * inv_std * a2 + b2).astype(jnp.bfloat16)

    # Sublayer: dense hidden->hidden on the MXU (bf16 operands, f32 accumulate).
    y = jnp.dot(normed, w_ref[...], preferred_element_type=jnp.float32)

    # Dropout (eval mode => identity) + bias fused into the residual add.
    o_ref[...] = (x + bias_ref[...].astype(jnp.float32) + y).astype(o_ref.dtype)


def _coltile_kernel(xfull_ref, xslab_ref, a2_ref, b2_ref, w_ref, bias_ref,
                    o_ref, normed_ref):
    """Large-H path: W tiled over output columns (grid axis j).  Normalized
    activations are computed once per row tile (j == 0) into a VMEM scratch and
    reused for every column slab."""
    j = pl.program_id(1)

    @pl.when(j == 0)
    def _():
        x = xfull_ref[...].astype(jnp.float32)               # (tm, H)
        h = x.shape[-1]
        sum_x = jnp.sum(x, axis=-1, keepdims=True)
        sum_x2 = jnp.sum(x * x, axis=-1, keepdims=True)
        mean = sum_x * (1.0 / h)
        var_unb = jnp.maximum((sum_x2 - sum_x * mean) * (1.0 / (h - 1)), 0.0)
        inv_std = pl.reciprocal(jnp.sqrt(var_unb) + _EPS, approx=False)
        a2 = a2_ref[...].astype(jnp.float32)
        b2 = b2_ref[...].astype(jnp.float32)
        normed_ref[...] = ((x - mean) * inv_std * a2 + b2).astype(jnp.bfloat16)

    y = jnp.dot(normed_ref[...], w_ref[...], preferred_element_type=jnp.float32)
    # TODO(synk): slicing xfull_ref along lanes with pl.ds(j*tn, tn) would save
    #             the second (column-slab) read of x; kept as a separate input
    #             block for robust lowering.
    o_ref[...] = (xslab_ref[...].astype(jnp.float32)
                  + bias_ref[...].astype(jnp.float32) + y).astype(o_ref.dtype)


# ---------------------------------------------------------------------------
# Tiling / VMEM budgeting
# ---------------------------------------------------------------------------
def _vmem_caps():
    try:
        cap = int(pltpu.get_tpu_info().vmem_capacity_bytes)
    except Exception:
        cap = 64 * 1024 * 1024                     # conservative (v7x-sized) fallback
    budget = max(int(cap * 0.8), 32 * 1024 * 1024)  # ~20% headroom for Mosaic internals
    return cap, budget


def _choose_tiles(rows, H, cap, budget, col_tile_threshold, force_col_tile):
    rows8 = _round_up(max(rows, 1), 8)
    # v7x (64 MiB/TC): keep row tiles <= 256; v5e/v6e (128 MiB): up to 512.
    max_tm = 256 if cap <= 64 * 1024 * 1024 else 512

    if force_col_tile is None:
        w_bytes = H * H * 2                        # resident bf16 W, single copy
        per_row = 32 * H                           # dbl-buffered f32 x/out + temporaries
        if H < col_tile_threshold and w_bytes + 8 * per_row <= budget:
            tm = min(max_tm, (budget - w_bytes) // per_row)
            tm = max(8, min(rows8, (tm // 8) * 8))
            return "resident", tm, None
        tn = next((t for t in (1024, 512, 256, 128) if H % t == 0), None)
        if tn is None:
            # TODO(synk): H not a multiple of 128 -> no lane-aligned column
            #             tiling; fall back to resident W with a small row tile.
            return "resident", max(8, min(rows8, 128)), None
    else:
        tn = int(force_col_tile)
        assert tn % 128 == 0 and H % tn == 0, \
            "force_col_tile must be a 128-multiple dividing H"

    # x full row (dbl) + normed scratch + x slab/out slab (dbl) + f32 temporaries
    per_row = 2 * H * 4 + H * 2 + 4 * tn * 4 + H * 4
    w_slab = 2 * H * tn * 2                        # double-buffered bf16 W column slab
    avail = max(budget - w_slab, 8 * per_row)
    tm = min(256, avail // per_row)
    tm = max(8, min(rows8, (tm // 8) * 8))
    return "coltile", tm, tn


# ---------------------------------------------------------------------------
# pallas_call wrappers
# ---------------------------------------------------------------------------
def _call_resident(x2, a2, b2, w, bias, tm, budget, single_buffer_params):
    rows, H = x2.shape

    def param_spec(shape):
        if single_buffer_params:
            return pl.BlockSpec(shape, lambda i: (0, 0), pipeline_mode=pl.Buffered(1))
        return pl.BlockSpec(shape, lambda i: (0, 0))

    return pl.pallas_call(
        _resident_kernel,
        out_shape=jax.ShapeDtypeStruct((rows, H), x2.dtype),
        grid_spec=pl.GridSpec(
            grid=(pl.cdiv(rows, tm),),
            in_specs=[
                pl.BlockSpec((tm, H), lambda i: (i, 0)),   # x row tile (pipelined)
                param_spec((1, H)),                        # a_2 (gamma), resident
                param_spec((1, H)),                        # b_2 (beta),  resident
                param_spec((H, H)),                        # W (bf16),    resident
                param_spec((1, H)),                        # bias,        resident
            ],
            out_specs=pl.BlockSpec((tm, H), lambda i: (i, 0)),
        ),
        compiler_params=pltpu.CompilerParams(
            dimension_semantics=("parallel",),             # shard row tiles across TCs
            vmem_limit_bytes=int(budget),
        ),
    )(x2, a2, b2, w, bias)


def _call_coltile(x2, a2, b2, w, bias, tm, tn, budget, single_buffer_params):
    rows, H = x2.shape

    def param_spec(shape):
        if single_buffer_params:
            return pl.BlockSpec(shape, lambda i, j: (0, 0), pipeline_mode=pl.Buffered(1))
        return pl.BlockSpec(shape, lambda i, j: (0, 0))

    return pl.pallas_call(
        _coltile_kernel,
        out_shape=jax.ShapeDtypeStruct((rows, H), x2.dtype),
        grid_spec=pltpu.PrefetchScalarGridSpec(
            num_scalar_prefetch=0,
            grid=(pl.cdiv(rows, tm), H // tn),
            in_specs=[
                pl.BlockSpec((tm, H), lambda i, j: (i, 0)),   # x full row (LN), reused over j
                pl.BlockSpec((tm, tn), lambda i, j: (i, j)),  # x column slab (residual)
                param_spec((1, H)),                           # a_2, resident
                param_spec((1, H)),                           # b_2, resident
                pl.BlockSpec((H, tn), lambda i, j: (0, j)),   # W column slab (pipelined)
                pl.BlockSpec((1, tn), lambda i, j: (0, j)),   # bias slab
            ],
            out_specs=pl.BlockSpec((tm, tn), lambda i, j: (i, j)),
            scratch_shapes=[pltpu.VMEM((tm, H), jnp.bfloat16)],  # normed, reused over j
        ),
        compiler_params=pltpu.CompilerParams(
            dimension_semantics=("parallel", "arbitrary"),
            vmem_limit_bytes=int(budget),
        ),
    )(x2, x2, a2, b2, w, bias)


# ---------------------------------------------------------------------------
# Public API
# ---------------------------------------------------------------------------
def prepare_sublayer_params(a2, b2, w, bias):
    """One-time parameter prep (call at weight-load time, NOT per forward):
    bf16 weight for the MXU and (1, H) f32 layouts for the vector params so no
    per-invocation cast/reshape HBM traffic remains in the hot path."""
    H = w.shape[0]
    return (jnp.asarray(a2, jnp.float32).reshape(1, H),
            jnp.asarray(b2, jnp.float32).reshape(1, H),
            jnp.asarray(w, jnp.bfloat16),
            jnp.asarray(bias, jnp.float32).reshape(1, H))


def sublayer_connection(x, a2, b2, w, bias, *, col_tile_threshold=3072,
                        force_col_tile=None):
    """out = x + Dense(LayerNorm(x)) with torch-style LN (unbiased std, eps on
    std) and eval-mode dropout (identity).  x: (B, S, H) -> (B, S, H)."""
    B, S, H = x.shape
    rows = B * S
    x2 = x.reshape(rows, H)

    # No-ops when params came from prepare_sublayer_params().
    a2 = jnp.asarray(a2, jnp.float32).reshape(1, H)
    b2 = jnp.asarray(b2, jnp.float32).reshape(1, H)
    bias = jnp.asarray(bias, jnp.float32).reshape(1, H)
    if w.dtype != jnp.bfloat16:
        w = w.astype(jnp.bfloat16)

    cap, budget = _vmem_caps()
    mode, tm, tn = _choose_tiles(rows, H, cap, budget, col_tile_threshold,
                                 force_col_tile)

    def run(single_buffer_params):
        if mode == "resident":
            return _call_resident(x2, a2, b2, w, bias, tm, budget,
                                  single_buffer_params)
        return _call_coltile(x2, a2, b2, w, bias, tm, tn, budget,
                             single_buffer_params)

    try:
        # Single-buffer the grid-invariant params (a2/b2/W/bias): halves their
        # resident VMEM footprint (double-buffering buys them nothing).
        out = run(True)
    except Exception:
        # Fallback for JAX builds that reject pipeline_mode=pl.Buffered(1).
        out = run(False)

    return out.reshape(B, S, H)


def reference(x, a2, b2, w, bias, eps=1e-6):
    """Module math; the sublayer matmul uses the same bf16-operand /
    f32-accumulate numerics as the kernel (apples-to-apples)."""
    mean = jnp.mean(x, axis=-1, keepdims=True)
    diff = x - mean
    var_unb = jnp.sum(diff * diff, axis=-1, keepdims=True) / (x.shape[-1] - 1)
    std = jnp.sqrt(var_unb)
    normed = a2 * diff / (std + eps) + b2
    y = jnp.dot(normed.astype(jnp.bfloat16), w.astype(jnp.bfloat16),
                preferred_element_type=jnp.float32)
    return x + bias + y


if __name__ == "__main__":
    key = jax.random.PRNGKey(0)
    k_case1, k_case2 = jax.random.split(key)

    def make_case(k, B, S, H):
        kx, kw, kb = jax.random.split(k, 3)
        x = jax.random.normal(kx, (B, S, H), dtype=jnp.float32)
        a2 = jnp.ones((H,), jnp.float32)            # LayerNorm a_2 init
        b2 = jnp.zeros((H,), jnp.float32)           # LayerNorm b_2 init
        w = jax.random.normal(kw, (H, H), dtype=jnp.float32) / jnp.sqrt(H)
        bias = jax.random.normal(kb, (H,), dtype=jnp.float32) * 0.01
        return x, a2, b2, w, bias

    # Case 1: resident-W fast path.  H=128 keeps the last dim lane-dense
    # (unmasked stores) while staying small.
    x, a2, b2, w, bias = make_case(k_case1, 2, 8, 128)
    params = prepare_sublayer_params(a2, b2, w, bias)    # one-time bf16 cast
    out = jax.block_until_ready(sublayer_connection(x, *params))
    ref = reference(x, a2, b2, w, bias)
    assert out.shape == x.shape
    assert jnp.allclose(out, ref, atol=2e-2, rtol=2e-2), "mismatch (resident-W path)"

    # Case 2: exercise the W-column-tiled (large-H / v7x) path at a small shape.
    x2_, a2_, b2_, w_, bias_ = make_case(k_case2, 2, 8, 256)
    p2 = prepare_sublayer_params(a2_, b2_, w_, bias_)
    out2 = jax.block_until_ready(
        sublayer_connection(x2_, *p2, force_col_tile=128))
    ref2 = reference(x2_, a2_, b2_, w_, bias_)
    assert out2.shape == x2_.shape
    assert jnp.allclose(out2, ref2, atol=2e-2, rtol=2e-2), "mismatch (column-tiled path)"

    print("KERNEL_OK")
</pallas_src>

<mosaic_0001>
module attributes {stable_mosaic.version = 11 : i64} {
  func.func @_resident_kernel(%arg0: i32, %arg1: memref<16x128xf32, #tpu.memory_space<vmem>>, %arg2: memref<1x128xf32, #tpu.memory_space<vmem>>, %arg3: memref<1x128xf32, #tpu.memory_space<vmem>>, %arg4: memref<128x128xbf16, #tpu.memory_space<vmem>>, %arg5: memref<1x128xf32, #tpu.memory_space<vmem>>, %arg6: memref<16x128xf32, #tpu.memory_space<vmem>>) attributes {dimension_semantics = [#tpu.dimension_semantics<parallel>], iteration_bounds = array<i64: 1>, scalar_prefetch = 0 : i64, scratch_operands = 0 : i64, tpu.core_type = #tpu.core_type<tc>, window_params = [{transform_indices = @transform_0, window_bounds = array<i64: 16, 128>}, {pipeline_mode = #tpu.pipeline_mode<synchronous>, transform_indices = @transform_1, window_bounds = array<i64: 1, 128>}, {pipeline_mode = #tpu.pipeline_mode<synchronous>, transform_indices = @transform_2, window_bounds = array<i64: 1, 128>}, {pipeline_mode = #tpu.pipeline_mode<synchronous>, transform_indices = @transform_3, window_bounds = array<i64: 128, 128>}, {pipeline_mode = #tpu.pipeline_mode<synchronous>, transform_indices = @transform_4, window_bounds = array<i64: 1, 128>}, {transform_indices = @transform_5, window_bounds = array<i64: 16, 128>}]} {
    %c0 = arith.constant 0 : index
    %c0_0 = arith.constant 0 : index
    %0 = vector.load %arg1[%c0, %c0_0] : memref<16x128xf32, #tpu.memory_space<vmem>>, vector<16x128xf32>
    %cst = arith.constant dense<0.000000e+00> : vector<16xf32>
    %1 = vector.multi_reduction <add>, %0, %cst [1] : vector<16x128xf32> to vector<16xf32>
    %2 = vector.shape_cast %1 : vector<16xf32> to vector<16x1xf32>
    %3 = arith.mulf %0, %0 : vector<16x128xf32>
    %cst_1 = arith.constant dense<0.000000e+00> : vector<16xf32>
    %4 = vector.multi_reduction <add>, %3, %cst_1 [1] : vector<16x128xf32> to vector<16xf32>
    %5 = vector.shape_cast %4 : vector<16xf32> to vector<16x1xf32>
    %cst_2 = arith.constant 7.812500e-03 : f32
    %6 = vector.broadcast %cst_2 : f32 to vector<16x1xf32>
    %7 = arith.mulf %2, %6 : vector<16x1xf32>
    %8 = arith.mulf %2, %7 : vector<16x1xf32>
    %9 = arith.subf %5, %8 : vector<16x1xf32>
    %cst_3 = arith.constant 0.00787401571 : f32
    %10 = vector.broadcast %cst_3 : f32 to vector<16x1xf32>
    %11 = arith.mulf %9, %10 : vector<16x1xf32>
    %cst_4 = arith.constant 0.000000e+00 : f32
    %12 = vector.broadcast %cst_4 : f32 to vector<16x1xf32>
    %13 = arith.maximumf %11, %12 : vector<16x1xf32>
    %14 = math.sqrt %13 : vector<16x1xf32>
    %cst_5 = arith.constant 9.99999997E-7 : f32
    %15 = vector.broadcast %cst_5 : f32 to vector<16x1xf32>
    %16 = arith.addf %14, %15 : vector<16x1xf32>
    %17 = tpu.reciprocal %16 : vector<16x1xf32> -> vector<16x1xf32>
    %c0_6 = arith.constant 0 : index
    %c0_7 = arith.constant 0 : index
    %18 = vector.load %arg2[%c0_6, %c0_7] : memref<1x128xf32, #tpu.memory_space<vmem>>, vector<1x128xf32>
    %c0_8 = arith.constant 0 : index
    %c0_9 = arith.constant 0 : index
    %19 = vector.load %arg3[%c0_8, %c0_9] : memref<1x128xf32, #tpu.memory_space<vmem>>, vector<1x128xf32>
    %20 = vector.broadcast %7 : vector<16x1xf32> to vector<16x128xf32>
    %21 = arith.subf %0, %20 : vector<16x128xf32>
    %22 = vector.broadcast %17 : vector<16x1xf32> to vector<16x128xf32>
    %23 = arith.mulf %21, %22 : vector<16x128xf32>
    %24 = vector.broadcast %18 : vector<1x128xf32> to vector<16x128xf32>
    %25 = arith.mulf %23, %24 : vector<16x128xf32>
    %26 = vector.broadcast %19 : vector<1x128xf32> to vector<16x128xf32>
    %27 = arith.addf %25, %26 : vector<16x128xf32>
    %28 = arith.truncf %27 : vector<16x128xf32> to vector<16x128xbf16>
    %c0_10 = arith.constant 0 : index
    %c0_11 = arith.constant 0 : index
    %29 = vector.load %arg4[%c0_10, %c0_11] : memref<128x128xbf16, #tpu.memory_space<vmem>>, vector<128x128xbf16>
    %cst_12 = arith.constant dense<0.000000e+00> : vector<16x128xf32>
    %30 = tpu.matmul %28, %29, %cst_12 {dimension_numbers = #tpu.dot_dimension_numbers<[1], [0], [0], [1], [0, 0, 1, 1], [], []>} : vector<16x128xbf16>, vector<128x128xbf16>, vector<16x128xf32> -> vector<16x128xf32>
    %c0_13 = arith.constant 0 : index
    %c0_14 = arith.constant 0 : index
    %31 = vector.load %arg5[%c0_13, %c0_14] : memref<1x128xf32, #tpu.memory_space<vmem>>, vector<1x128xf32>
    %32 = vector.broadcast %31 : vector<1x128xf32> to vector<16x128xf32>
    %33 = arith.addf %0, %32 : vector<16x128xf32>
    %34 = arith.addf %33, %30 : vector<16x128xf32>
    %c0_15 = arith.constant 0 : index
    %c0_16 = arith.constant 0 : index
    %35 = vector.load %arg6[%c0_15, %c0_16] : memref<16x128xf32, #tpu.memory_space<vmem>>, vector<16x128xf32>
    tpu.vector_store %arg6[%c0_15, %c0_16], %34 {strides = array<i32>} : memref<16x128xf32, #tpu.memory_space<vmem>>, vector<16x128xf32>,
    return
  }
  func.func @transform_0(%arg0: i32) -> (i32, i32) {
    %c0_i32 = arith.constant 0 : i32
    %c0_i32_0 = arith.constant 0 : i32
    return %arg0, %c0_i32 : i32, i32
  }
  func.func @transform_1(%arg0: i32) -> (i32, i32) {
    %c0_i32 = arith.constant 0 : i32
    %c0_i32_0 = arith.constant 0 : i32
    %c0_i32_1 = arith.constant 0 : i32
    return %c0_i32, %c0_i32_0 : i32, i32
  }
  func.func @transform_2(%arg0: i32) -> (i32, i32) {
    %c0_i32 = arith.constant 0 : i32
    %c0_i32_0 = arith.constant 0 : i32
    %c0_i32_1 = arith.constant 0 : i32
    return %c0_i32, %c0_i32_0 : i32, i32
  }
  func.func @transform_3(%arg0: i32) -> (i32, i32) {
    %c0_i32 = arith.constant 0 : i32
    %c0_i32_0 = arith.constant 0 : i32
    %c0_i32_1 = arith.constant 0 : i32
    return %c0_i32, %c0_i32_0 : i32, i32
  }
  func.func @transform_4(%arg0: i32) -> (i32, i32) {
    %c0_i32 = arith.constant 0 : i32
    %c0_i32_0 = arith.constant 0 : i32
    %c0_i32_1 = arith.constant 0 : i32
    return %c0_i32, %c0_i32_0 : i32, i32
  }
  func.func @transform_5(%arg0: i32) -> (i32, i32) {
    %c0_i32 = arith.constant 0 : i32
    %c0_i32_0 = arith.constant 0 : i32
    return %arg0, %c0_i32 : i32, i32
  }
}

module attributes {stable_mosaic.version = 11 : i64} {
  func.func @_resident_kernel(%arg0: i32, %arg1: memref<16x128xf32, #tpu.memory_space<vmem>>, %arg2: memref<1x128xf32, #tpu.memory_space<vmem>>, %arg3: memref<1x128xf32, #tpu.memory_space<vmem>>, %arg4: memref<128x128xbf16, #tpu.memory_space<vmem>>, %arg5: memref<1x128xf32, #tpu.memory_space<vmem>>, %arg6: memref<16x128xf32, #tpu.memory_space<vmem>>) attributes {dimension_semantics = [#tpu.dimension_semantics<parallel>], iteration_bounds = array<i64: 1>, scalar_prefetch = 0 : i64, scratch_operands = 0 : i64, tpu.core_type = #tpu.core_type<tc>, window_params = [{transform_indices = @transform_0, window_bounds = array<i64: 16, 128>}, {pipeline_mode = #tpu.pipeline_mode<synchronous>, transform_indices = @transform_1, window_bounds = array<i64: 1, 128>}, {pipeline_mode = #tpu.pipeline_mode<synchronous>, transform_indices = @transform_2, window_bounds = array<i64: 1, 128>}, {pipeline_mode = #tpu.pipeline_mode<synchronous>, transform_indices = @transform_3, window_bounds = array<i64: 128, 128>}, {pipeline_mode = #tpu.pipeline_mode<synchronous>, transform_indices = @transform_4, window_bounds = array<i64: 1, 128>}, {transform_indices = @transform_5, window_bounds = array<i64: 16, 128>}]} {
    %c0 = arith.constant 0 : index
    %c0_0 = arith.constant 0 : index
    %0 = vector.load %arg1[%c0, %c0_0] : memref<16x128xf32, #tpu.memory_space<vmem>>, vector<16x128xf32>
    %cst = arith.constant dense<0.000000e+00> : vector<16xf32>
    %1 = vector.multi_reduction <add>, %0, %cst [1] : vector<16x128xf32> to vector<16xf32>
    %2 = vector.shape_cast %1 : vector<16xf32> to vector<16x1xf32>
    %3 = arith.mulf %0, %0 : vector<16x128xf32>
    %cst_1 = arith.constant dense<0.000000e+00> : vector<16xf32>
    %4 = vector.multi_reduction <add>, %3, %cst_1 [1] : vector<16x128xf32> to vector<16xf32>
    %5 = vector.shape_cast %4 : vector<16xf32> to vector<16x1xf32>
    %cst_2 = arith.constant 7.812500e-03 : f32
    %6 = vector.broadcast %cst_2 : f32 to vector<16x1xf32>
    %7 = arith.mulf %2, %6 : vector<16x1xf32>
    %8 = arith.mulf %2, %7 : vector<16x1xf32>
    %9 = arith.subf %5, %8 : vector<16x1xf32>
    %cst_3 = arith.constant 0.00787401571 : f32
    %10 = vector.broadcast %cst_3 : f32 to vector<16x1xf32>
    %11 = arith.mulf %9, %10 : vector<16x1xf32>
    %cst_4 = arith.constant 0.000000e+00 : f32
    %12 = vector.broadcast %cst_4 : f32 to vector<16x1xf32>
    %13 = arith.maximumf %11, %12 : vector<16x1xf32>
    %14 = math.sqrt %13 : vector<16x1xf32>
    %cst_5 = arith.constant 9.99999997E-7 : f32
    %15 = vector.broadcast %cst_5 : f32 to vector<16x1xf32>
    %16 = arith.addf %14, %15 : vector<16x1xf32>
    %17 = tpu.reciprocal %16 : vector<16x1xf32> -> vector<16x1xf32>
    %c0_6 = arith.constant 0 : index
    %c0_7 = arith.constant 0 : index
    %18 = vector.load %arg2[%c0_6, %c0_7] : memref<1x128xf32, #tpu.memory_space<vmem>>, vector<1x128xf32>
    %c0_8 = arith.constant 0 : index
    %c0_9 = arith.constant 0 : index
    %19 = vector.load %arg3[%c0_8, %c0_9] : memref<1x128xf32, #tpu.memory_space<vmem>>, vector<1x128xf32>
    %20 = vector.broadcast %7 : vector<16x1xf32> to vector<16x128xf32>
    %21 = arith.subf %0, %20 : vector<16x128xf32>
    %22 = vector.broadcast %17 : vector<16x1xf32> to vector<16x128xf32>
    %23 = arith.mulf %21, %22 : vector<16x128xf32>
    %24 = vector.broadcast %18 : vector<1x128xf32> to vector<16x128xf32>
    %25 = arith.mulf %23, %24 : vector<16x128xf32>
    %26 = vector.broadcast %19 : vector<1x128xf32> to vector<16x128xf32>
    %27 = arith.addf %25, %26 : vector<16x128xf32>
    %28 = arith.truncf %27 : vector<16x128xf32> to vector<16x128xbf16>
    %c0_10 = arith.constant 0 : index
    %c0_11 = arith.constant 0 : index
    %29 = vector.load %arg4[%c0_10, %c0_11] : memref<128x128xbf16, #tpu.memory_space<vmem>>, vector<128x128xbf16>
    %cst_12 = arith.constant dense<0.000000e+00> : vector<16x128xf32>
    %30 = tpu.matmul %28, %29, %cst_12 {dimension_numbers = #tpu.dot_dimension_numbers<[1], [0], [0], [1], [0, 0, 1, 1], [], []>} : vector<16x128xbf16>, vector<128x128xbf16>, vector<16x128xf32> -> vector<16x128xf32>
    %c0_13 = arith.constant 0 : index
    %c0_14 = arith.constant 0 : index
    %31 = vector.load %arg5[%c0_13, %c0_14] : memref<1x128xf32, #tpu.memory_space<vmem>>, vector<1x128xf32>
    %32 = vector.broadcast %31 : vector<1x128xf32> to vector<16x128xf32>
    %33 = arith.addf %0, %32 : vector<16x128xf32>
    %34 = arith.addf %33, %30 : vector<16x128xf32>
    %c0_15 = arith.constant 0 : index
    %c0_16 = arith.constant 0 : index
    %35 = vector.load %arg6[%c0_15, %c0_16] : memref<16x128xf32, #tpu.memory_space<vmem>>, vector<16x128xf32>
    tpu.vector_store %arg6[%c0_15, %c0_16], %34 {strides = array<i32>} : memref<16x128xf32, #tpu.memory_space<vmem>>, vector<16x128xf32>,
    return
  }
  func.func @transform_0(%arg0: i32) -> (i32, i32) {
    %c0_i32 = arith.constant 0 : i32
    %c0_i32_0 = arith.constant 0 : i32
    return %arg0, %c0_i32 : i32, i32
  }
  func.func @transform_1(%arg0: i32) -> (i32, i32) {
    %c0_i32 = arith.constant 0 : i32
    %c0_i32_0 = arith.constant 0 : i32
    %c0_i32_1 = arith.constant 0 : i32
    return %c0_i32, %c0_i32_0 : i32, i32
  }
  func.func @transform_2(%arg0: i32) -> (i32, i32) {
    %c0_i32 = arith.constant 0 : i32
    %c0_i32_0 = arith.constant 0 : i32
    %c0_i32_1 = arith.constant 0 : i32
    return %c0_i32, %c0_i32_0 : i32, i32
  }
  func.func @transform_3(%arg0: i32) -> (i32, i32) {
    %c0_i32 = arith.constant 0 : i32
    %c0_i32_0 = arith.constant 0 : i32
    %c0_i32_1 = arith.constant 0 : i32
    return %c0_i32, %c0_i32_0 : i32, i32
  }
  func.func @transform_4(%arg0: i32) -> (i32, i32) {
    %c0_i32 = arith.constant 0 : i32
    %c0_i32_0 = arith.constant 0 : i32
    %c0_i32_1 = arith.constant 0 : i32
    return %c0_i32, %c0_i32_0 : i32, i32
  }
  func.func @transform_5(%arg0: i32) -> (i32, i32) {
    %c0_i32 = arith.constant 0 : i32
    %c0_i32_0 = arith.constant 0 : i32
    return %arg0, %c0_i32 : i32, i32
  }
}

</mosaic_0001>

<bundles_post_ra>
// kernel: tpu_custom_call.1
= control target key start
LH: loop header
LB: loop body
LE: loop exit
PB: predicated region body
PF: predicated region fallthrough
CT: control target
= control target key end

     0   :  { %10 = vsyncpa [#allocation3], 0  ;;  %s490_s0 = inlined_call_operand.hbm [shape: f32[16,128], index: 0, kind: input, shape index: {}]   ;;  %s491_s1 = inlined_call_operand.vmem [shape: f32[1,128], index: 1, kind: input, shape index: {}]   ;;  %s492_s2 = inlined_call_operand.vmem [shape: f32[1,128], index: 2, kind: input, shape index: {}]   ;;  %s493_s3 = inlined_call_operand.hbm [shape: bf16[128,128], index: 3, kind: input, shape index: {}]   ;;  %s494_s4 = inlined_call_operand.vmem [shape: f32[1,128], index: 4, kind: input, shape index: {}]   ;;  %s495_s5 = inlined_call_operand.hbm [shape: f32[16,128], index: 5, kind: output, shape index: {}]  }
   0x1   :  { %11 = vsyncpa [#allocation6], 0 }
   0x2   :  { %12 = vsyncpa [#allocation4], 0  ;;  %s386_s18 = smov [#allocation2]   ;;  %s314_s22 = scalar_lea.hbm %s490_s0, 256 }
   0x3   :  { %s18_s19 = sshll.u32 %s386_s18, 4  ;;  %p315_p0 = scmp.ne.s32.totalorder %s490_s0, %s314_s22  ;;  %s19_s19 = int_to_ptr.vmem [resolvable:$true] %s18_s19 }
   0x4   :  { %p318_p1 = scmp.lt.u32.totalorder %s314_s22, %s490_s0 }
   0x6   :  { %p320_p2 = pnand %p318_p1, %p315_p0 }
   0x8   :  { %323 = shalt.err (!%p320_p2)
}
   0x9   :  { %s324_s27 = scalar_lea.vmem %s19_s19, 256  ;;  %p329_p4 = scmp.lt.s32.totalorder %s19_s19, %s19_s19 }
   0xa   :  { %p325_p3 = scmp.ne.s32.totalorder %s19_s19, %s324_s27  ;;  %p330_p5 = scmp.lt.s32.totalorder %s324_s27, %s324_s27 }
   0xc   :  { %p331_p6 = por %p330_p5, %p329_p4 }
   0xe   :  { %p332_p7 = pnand %p331_p6, %p325_p3 }
  0x10   :  { %335 = shalt.err (!%p332_p7)
}
  0x11   :  { %s387_s28 = smov 128   ;;  %s388_s29 = smov 8  }
  0x12   :  { %24 = dma.hbm_to_vmem [thread:$0]  %s490_s0, 256, %s19_s19, [#allocation3], %s387_s28, %s387_s28, %s388_s29  }
  0x13   :  { %s389_s7 = smov [#allocation5]   ;;  %s336_s11 = scalar_lea.hbm %s493_s3, 1024 }
  0x14   :  { %s34_s8 = sshll.u32 %s389_s7, 4  ;;  %p337_p8 = scmp.ne.s32.totalorder %s493_s3, %s336_s11  ;;  %s35_s8 = int_to_ptr.vmem [resolvable:$true] %s34_s8 }
  0x15   :  { %p340_p9 = scmp.lt.u32.totalorder %s336_s11, %s493_s3 }
  0x17   :  { %p342_p10 = pnand %p340_p9, %p337_p8 }
  0x19   :  { %345 = shalt.err (!%p342_p10)
}
  0x1a   :  { %s346_s16 = scalar_lea.vmem %s35_s8, 1024  ;;  %p351_p12 = scmp.lt.s32.totalorder %s35_s8, %s35_s8 }
  0x1b   :  { %p347_p11 = scmp.ne.s32.totalorder %s35_s8, %s346_s16  ;;  %p352_p13 = scmp.lt.s32.totalorder %s346_s16, %s346_s16 }
  0x1d   :  { %p353_p0 = por %p352_p13, %p351_p12 }
  0x1f   :  { %p354_p1 = pnand %p353_p0, %p347_p11 }
  0x21   :  { %357 = shalt.err (!%p354_p1)
}
  0x22   :  { %s390_s0 = smov 64   ;;  %s391_s17 = smov 4  }
  0x23   :  { %40 = dma.hbm_to_vmem [thread:$0]  %s493_s3, 1024, %s35_s8, [#allocation6], %s390_s0, %s390_s0, %s391_s17  }
  0x24   :  { %380 = dma.done.wait [#allocation3], 256  }
  0x25   :  { %381 = vsyncadd [#allocation3], 4294967040 }
  0x26   :  { %382 = dma.done.wait [#allocation6], 1024  }
  0x27   :  { %383 = vsyncadd [#allocation6], 4294966272  ;;  %v452_v0 = vld [vmem:[#allocation2] sm:$0xff]  ;;  %v454_v1 = vld [vmem:[#allocation2 + $0x8] sm:$0xff]  ;;  %v392_v5 = vmov 0.0   ;;  %vm393_vm0 = vmmov 0  }
  0x28   :  { %52 = vadd.xlane.f32.xlu0 %v452_v0  ;;  %v56_v2 = vmul.f32 %v452_v0, %v452_v0  ;;  %v57_v3 = vmul.f32 %v454_v1, %v454_v1  ;;  %v298_v4 = vld [vmem:[#allocation5] sm:$0xff]   ;;  %269 = vmatprep.subr.bf16.mxu0 %v392_v5  ;;  %v299_v6 = vld [vmem:[#allocation5 + $0x8] sm:$0xff]   ;;  %v300_v7 = vld [vmem:[#allocation5 + $0x10] sm:$0xff]  }
  0x29   :  { %270 = vmatpush3.bf16.msra.mxu0 %v298_v4  ;;  %v301_v8 = vld [vmem:[#allocation5 + $0x18] sm:$0xff]   ;;  %285 = vmatprep.mubr.msk.bf16.mxu0 %vm393_vm0, %v392_v5  ;;  %v302_v9 = vld [vmem:[#allocation5 + $0x20] sm:$0xff]   ;;  %v303_v10 = vld [vmem:[#allocation5 + $0x28] sm:$0xff]  }
  0x2a   :  { %58 = vadd.xlane.f32.xlu1 %v56_v2  ;;  %271 = vmatprep.subr.bf16.mxu0 %v392_v5  ;;  %v304_v11 = vld [vmem:[#allocation5 + $0x30] sm:$0xff]   ;;  %v305_v12 = vld [vmem:[#allocation5 + $0x38] sm:$0xff]  }
  0x2b   :  { %v249_v42 = vld [vmem:[%s491_s1] ss:$0 sm:$0xff]  ;;  %s394_s1 = smov [#allocation7]  }
  0x2c   :  { %54 = vadd.xlane.f32.xlu0 %v454_v1  ;;  %v250_v47 = vld [vmem:[%s492_s2] ss:$0 sm:$0xff]  ;;  %s236_s25 = sshll.u32 %s394_s1, 4  ;;  %s237_s25 = int_to_ptr.vmem [resolvable:$true] %s236_s25 }
  0x2d   :  { %272 = vmatpush3.bf16.msra.mxu0 %v299_v6  ;;  %v259_v52 = vld [vmem:[%s494_s4] ss:$0 sm:$0xff]  ;;  %s358_s2 = scalar_lea.vmem %s237_s25, 256  ;;  %p363_p3 = scmp.lt.s32.totalorder %s237_s25, %s237_s25 }
  0x2e   :  { %60 = vadd.xlane.f32.xlu1 %v57_v3  ;;  %273 = vmatprep.subr.bf16.mxu0 %v392_v5  ;;  %v225_v53 = vadd.f32 %v259_v52, %v452_v0  ;;  %v226_v54 = vadd.f32 %v259_v52, %v454_v1  ;;  %p359_p2 = scmp.ne.s32.totalorder %s237_s25, %s358_s2  ;;  %p364_p4 = scmp.lt.s32.totalorder %s358_s2, %s358_s2 }
  0x30   :  { %p365_p5 = por %p364_p4, %p363_p3 }
  0x31   :  { %274 = vmatpush3.bf16.msra.mxu0 %v300_v7 }
  0x32   :  { %275 = vmatprep.subr.bf16.mxu0 %v392_v5  ;;  %p366_p6 = pnand %p365_p5, %p359_p2 }
  0x35   :  { %276 = vmatpush3.bf16.msra.mxu0 %v301_v8 }
  0x36   :  { %277 = vmatprep.subr.bf16.mxu0 %v392_v5 }
  0x39   :  { %278 = vmatpush3.bf16.msra.mxu0 %v302_v9 }
  0x3a   :  { %279 = vmatprep.subr.bf16.mxu0 %v392_v5 }
  0x3d   :  { %280 = vmatpush3.bf16.msra.mxu0 %v303_v10 }
  0x3e   :  { %281 = vmatprep.subr.bf16.mxu0 %v392_v5 }
  0x41   :  { %282 = vmatpush3.bf16.msra.mxu0 %v304_v11 }
  0x42   :  { %283 = vmatprep.subr.bf16.mxu0 %v392_v5 }
  0x45   :  { %284 = vmatpush3.bf16.msra.mxu0 %v305_v12 }
  0xb5   :  { %v53_v13 = vpop.xlane.xlu0 %52 }
  0xb6   :  { %v62_v14 = vmul.f32 0.0078125, %v53_v13 }
  0xb7   :  { %v59_v15 = vpop.xlane.xlu1 %58 }
  0xb8   :  { %v64_v16 = vmul.f32 %v62_v14, %v53_v13  ;;  %v92_v40 = vsub.f32 %v452_v0, %v62_v14 }
  0xb9   :  { %v55_v17 = vpop.xlane.xlu0 %54 }
  0xba   :  { %v63_v18 = vmul.f32 0.0078125, %v55_v17  ;;  %v66_v19 = vsub.f32 %v59_v15, %v64_v16 }
  0xbb   :  { %v61_v20 = vpop.xlane.xlu1 %60 }
  0xbc   :  { %v65_v21 = vmul.f32 %v63_v18, %v55_v17  ;;  %v68_v22 = vmul.f32 0.007874016, %v66_v19  ;;  %v93_v43 = vsub.f32 %v454_v1, %v63_v18 }
  0xbe   :  { %v70_v23 = vmax.f32 %v68_v22, 0.0  ;;  %v67_v24 = vsub.f32 %v61_v20, %v65_v21 }
  0xc0   :  { %306 = vrsqrt.f32 %v70_v23  ;;  %v69_v25 = vmul.f32 0.007874016, %v67_v24  ;;  %vm74_vm1 = vcmp.eq.f32.partialorder %v70_v23, inf  ;;  %v77_v29 = vand.u32 2147483648, %v70_v23 }
  0xc1   :  { %vm76_vm2 = vcmp.eq.f32.partialorder %v70_v23, 0.0 }
  0xc2   :  { %v71_v26 = vmax.f32 %v69_v25, 0.0 }
  0xc4   :  { %308 = vrsqrt.f32 %v71_v26  ;;  %vm81_vm3 = vcmp.eq.f32.partialorder %v71_v26, inf  ;;  %v84_v35 = vand.u32 2147483648, %v71_v26  ;;  %vm83_vm4 = vcmp.eq.f32.partialorder %v71_v26, 0.0 }
  0xca   :  { %v307_v27 = vpop.eup %306 }
  0xcb   :  { %v73_v28 = vmul.f32 %v307_v27, %v70_v23 }
  0xcd   :  { %v75_v30 = vsel %vm74_vm1, %v70_v23, %v73_v28 }
  0xce   :  { %v78_v31 = vsel %vm76_vm2, %v77_v29, %v75_v30  ;;  %v309_v32 = vpop.eup %308 }
  0xcf   :  { %v86_v33 = vadd.f32 1e-06, %v78_v31  ;;  %v80_v34 = vmul.f32 %v309_v32, %v71_v26 }
  0xd1   :  { %310 = vrcp.f32 %v86_v33  ;;  %v82_v36 = vsel %vm81_vm3, %v71_v26, %v80_v34 }
  0xd2   :  { %v85_v37 = vsel %vm83_vm4, %v84_v35, %v82_v36 }
  0xd3   :  { %v87_v38 = vadd.f32 1e-06, %v85_v37 }
  0xd5   :  { %312 = vrcp.f32 %v87_v38 }
  0xdb   :  { %v311_v39 = vpop.eup %310 }
  0xdc   :  { %v94_v41 = vmul.f32 %v311_v39, %v92_v40 }
  0xde   :  { %v102_v46 = vmul.f32 %v249_v42, %v94_v41 }
  0xdf   :  { %v313_v44 = vpop.eup %312 }
  0xe0   :  { %v95_v45 = vmul.f32 %v313_v44, %v93_v43  ;;  %v110_v49 = vadd.f32 %v250_v47, %v102_v46 }
  0xe2   :  { %v103_v48 = vmul.f32 %v249_v42, %v95_v45 }
  0xe4   :  { %v111_v50 = vadd.f32 %v250_v47, %v103_v48 }
  0xe6   :  { %v112_v51 = vpack.c.bf16 %v111_v50, %v110_v49 }
  0xe8   :  { %286 = vmatmul.mubr.bf16.vlgmr.msra.gmra.mrb[0].mxu0 %v112_v51 }
 0x1bb   :  { %v211_v55 = vpop.f32.mrb[0].mxu0 }
 0x1bc   :  { %v227_v56 = vadd.f32 %v225_v53, %v211_v55  ;;  %v287_v57 = vpop.f32.mrb[1].mxu0 }
 0x1bd   :  { %v214_v58 = vpop.f32.mrb[2].mxu0 }
 0x1be   :  { %229 = vst [vmem:[#allocation7] sm:$0xff] %v227_v56  ;;  %v228_v59 = vadd.f32 %v226_v54, %v214_v58  ;;  %v288_v60 = vpop.f32.mrb[3].mxu0 }
 0x1c0   :  { %230 = vst [vmem:[#allocation7 + $0x8] sm:$0xff] %v228_v59 }
 0x1c1   :  { %369 = shalt.err (!%p366_p6)
}
 0x1c2   :  { %s370_s27 = scalar_lea.hbm %s495_s5, 256 }
 0x1c3   :  { %p371_p7 = scmp.ne.s32.totalorder %s495_s5, %s370_s27  ;;  %p374_p8 = scmp.lt.u32.totalorder %s370_s27, %s495_s5 }
 0x1c5   :  { %p376_p9 = pnand %p374_p8, %p371_p7 }
 0x1c7   :  { %379 = shalt.err (!%p376_p9)
}
 0x1c8   :  { %242 = dma.vmem_to_hbm [thread:$0]  %s237_s25, 256, %s495_s5, [#allocation4], %s387_s28, %s387_s28, %s388_s29  }
 0x1c9   :  { %384 = dma.done.wait [#allocation4], 256  }
 0x1ca   :  { %385 = vsyncadd [#allocation4], 4294967040 }
 0x1cb   :  { %246 = vsyncpa [#allocation3], 1 }
 0x1cc   :  { %247 = vsyncpa [#allocation6], 1 }
 0x1cd   :  { %248 = vsyncpa [#allocation4], 1 }

// kernel: tpu_custom_call.1
= control target key start
LH: loop header
LB: loop body
LE: loop exit
PB: predicated region body
PF: predicated region fallthrough
CT: control target
= control target key end

     0   :  { %10 = vsyncpa [#allocation3], 0  ;;  %s490_s0 = inlined_call_operand.hbm [shape: f32[16,128], index: 0, kind: input, shape index: {}]   ;;  %s491_s1 = inlined_call_operand.vmem [shape: f32[1,128], index: 1, kind: input, shape index: {}]   ;;  %s492_s2 = inlined_call_operand.vmem [shape: f32[1,128], index: 2, kind: input, shape index: {}]   ;;  %s493_s3 = inlined_call_operand.hbm [shape: bf16[128,128], index: 3, kind: input, shape index: {}]   ;;  %s494_s4 = inlined_call_operand.vmem [shape: f32[1,128], index: 4, kind: input, shape index: {}]   ;;  %s495_s5 = inlined_call_operand.hbm [shape: f32[16,128], index: 5, kind: output, shape index: {}]  }
   0x1   :  { %11 = vsyncpa [#allocation6], 0 }
   0x2   :  { %12 = vsyncpa [#allocation4], 0  ;;  %s386_s18 = smov [#allocation2]   ;;  %s314_s22 = scalar_lea.hbm %s490_s0, 256 }
   0x3   :  { %s18_s19 = sshll.u32 %s386_s18, 4  ;;  %p315_p0 = scmp.ne.s32.totalorder %s490_s0, %s314_s22  ;;  %s19_s19 = int_to_ptr.vmem [resolvable:$true] %s18_s19 }
   0x4   :  { %p318_p1 = scmp.lt.u32.totalorder %s314_s22, %s490_s0 }
   0x6   :  { %p320_p2 = pnand %p318_p1, %p315_p0 }
   0x8   :  { %323 = shalt.err (!%p320_p2)
}
   0x9   :  { %s324_s27 = scalar_lea.vmem %s19_s19, 256  ;;  %p329_p4 = scmp.lt.s32.totalorder %s19_s19, %s19_s19 }
   0xa   :  { %p325_p3 = scmp.ne.s32.totalorder %s19_s19, %s324_s27  ;;  %p330_p5 = scmp.lt.s32.totalorder %s324_s27, %s324_s27 }
   0xc   :  { %p331_p6 = por %p330_p5, %p329_p4 }
   0xe   :  { %p332_p7 = pnand %p331_p6, %p325_p3 }
  0x10   :  { %335 = shalt.err (!%p332_p7)
}
  0x11   :  { %s387_s28 = smov 128   ;;  %s388_s29 = smov 8  }
  0x12   :  { %24 = dma.hbm_to_vmem [thread:$0]  %s490_s0, 256, %s19_s19, [#allocation3], %s387_s28, %s387_s28, %s388_s29  }
  0x13   :  { %s389_s7 = smov [#allocation5]   ;;  %s336_s11 = scalar_lea.hbm %s493_s3, 1024 }
  0x14   :  { %s34_s8 = sshll.u32 %s389_s7, 4  ;;  %p337_p8 = scmp.ne.s32.totalorder %s493_s3, %s336_s11  ;;  %s35_s8 = int_to_ptr.vmem [resolvable:$true] %s34_s8 }
  0x15   :  { %p340_p9 = scmp.lt.u32.totalorder %s336_s11, %s493_s3 }
  0x17   :  { %p342_p10 = pnand %p340_p9, %p337_p8 }
  0x19   :  { %345 = shalt.err (!%p342_p10)
}
  0x1a   :  { %s346_s16 = scalar_lea.vmem %s35_s8, 1024  ;;  %p351_p12 = scmp.lt.s32.totalorder %s35_s8, %s35_s8 }
  0x1b   :  { %p347_p11 = scmp.ne.s32.totalorder %s35_s8, %s346_s16  ;;  %p352_p13 = scmp.lt.s32.totalorder %s346_s16, %s346_s16 }
  0x1d   :  { %p353_p0 = por %p352_p13, %p351_p12 }
  0x1f   :  { %p354_p1 = pnand %p353_p0, %p347_p11 }
  0x21   :  { %357 = shalt.err (!%p354_p1)
}
  0x22   :  { %s390_s0 = smov 64   ;;  %s391_s17 = smov 4  }
  0x23   :  { %40 = dma.hbm_to_vmem [thread:$0]  %s493_s3, 1024, %s35_s8, [#allocation6], %s390_s0, %s390_s0, %s391_s17  }
  0x24   :  { %380 = dma.done.wait [#allocation3], 256  }
  0x25   :  { %381 = vsyncadd [#allocation3], 4294967040 }
  0x26   :  { %382 = dma.done.wait [#allocation6], 1024  }
  0x27   :  { %383 = vsyncadd [#allocation6], 4294966272  ;;  %v452_v0 = vld [vmem:[#allocation2] sm:$0xff]  ;;  %v454_v1 = vld [vmem:[#allocation2 + $0x8] sm:$0xff]  ;;  %v392_v5 = vmov 0.0   ;;  %vm393_vm0 = vmmov 0  }
  0x28   :  { %52 = vadd.xlane.f32.xlu0 %v452_v0  ;;  %v56_v2 = vmul.f32 %v452_v0, %v452_v0  ;;  %v57_v3 = vmul.f32 %v454_v1, %v454_v1  ;;  %v298_v4 = vld [vmem:[#allocation5] sm:$0xff]   ;;  %269 = vmatprep.subr.bf16.mxu0 %v392_v5  ;;  %v299_v6 = vld [vmem:[#allocation5 + $0x8] sm:$0xff]   ;;  %v300_v7 = vld [vmem:[#allocation5 + $0x10] sm:$0xff]  }
  0x29   :  { %270 = vmatpush3.bf16.msra.mxu0 %v298_v4  ;;  %v301_v8 = vld [vmem:[#allocation5 + $0x18] sm:$0xff]   ;;  %285 = vmatprep.mubr.msk.bf16.mxu0 %vm393_vm0, %v392_v5  ;;  %v302_v9 = vld [vmem:[#allocation5 + $0x20] sm:$0xff]   ;;  %v303_v10 = vld [vmem:[#allocation5 + $0x28] sm:$0xff]  }
  0x2a   :  { %58 = vadd.xlane.f32.xlu1 %v56_v2  ;;  %271 = vmatprep.subr.bf16.mxu0 %v392_v5  ;;  %v304_v11 = vld [vmem:[#allocation5 + $0x30] sm:$0xff]   ;;  %v305_v12 = vld [vmem:[#allocation5 + $0x38] sm:$0xff]  }
  0x2b   :  { %v249_v42 = vld [vmem:[%s491_s1] ss:$0 sm:$0xff]  ;;  %s394_s1 = smov [#allocation7]  }
  0x2c   :  { %54 = vadd.xlane.f32.xlu0 %v454_v1  ;;  %v250_v47 = vld [vmem:[%s492_s2] ss:$0 sm:$0xff]  ;;  %s236_s25 = sshll.u32 %s394_s1, 4  ;;  %s237_s25 = int_to_ptr.vmem [resolvable:$true] %s236_s25 }
  0x2d   :  { %272 = vmatpush3.bf16.msra.mxu0 %v299_v6  ;;  %v259_v52 = vld [vmem:[%s494_s4] ss:$0 sm:$0xff]  ;;  %s358_s2 = scalar_lea.vmem %s237_s25, 256  ;;  %p363_p3 = scmp.lt.s32.totalorder %s237_s25, %s237_s25 }
  0x2e   :  { %60 = vadd.xlane.f32.xlu1 %v57_v3  ;;  %273 = vmatprep.subr.bf16.mxu0 %v392_v5  ;;  %v225_v53 = vadd.f32 %v259_v52, %v452_v0  ;;  %v226_v54 = vadd.f32 %v259_v52, %v454_v1  ;;  %p359_p2 = scmp.ne.s32.totalorder %s237_s25, %s358_s2  ;;  %p364_p4 = scmp.lt.s32.totalorder %s358_s2, %s358_s2 }
  0x30   :  { %p365_p5 = por %p364_p4, %p363_p3 }
  0x31   :  { %274 = vmatpush3.bf16.msra.mxu0 %v300_v7 }
  0x32   :  { %275 = vmatprep.subr.bf16.mxu0 %v392_v5  ;;  %p366_p6 = pnand %p365_p5, %p359_p2 }
  0x35   :  { %276 = vmatpush3.bf16.msra.mxu0 %v301_v8 }
  0x36   :  { %277 = vmatprep.subr.bf16.mxu0 %v392_v5 }
  0x39   :  { %278 = vmatpush3.bf16.msra.mxu0 %v302_v9 }
  0x3a   :  { %279 = vmatprep.subr.bf16.mxu0 %v392_v5 }
  0x3d   :  { %280 = vmatpush3.bf16.msra.mxu0 %v303_v10 }
  0x3e   :  { %281 = vmatprep.subr.bf16.mxu0 %v392_v5 }
  0x41   :  { %282 = vmatpush3.bf16.msra.mxu0 %v304_v11 }
  0x42   :  { %283 = vmatprep.subr.bf16.mxu0 %v392_v5 }
  0x45   :  { %284 = vmatpush3.bf16.msra.mxu0 %v305_v12 }
  0xb5   :  { %v53_v13 = vpop.xlane.xlu0 %52 }
  0xb6   :  { %v62_v14 = vmul.f32 0.0078125, %v53_v13 }
  0xb7   :  { %v59_v15 = vpop.xlane.xlu1 %58 }
  0xb8   :  { %v64_v16 = vmul.f32 %v62_v14, %v53_v13  ;;  %v92_v40 = vsub.f32 %v452_v0, %v62_v14 }
  0xb9   :  { %v55_v17 = vpop.xlane.xlu0 %54 }
  0xba   :  { %v63_v18 = vmul.f32 0.0078125, %v55_v17  ;;  %v66_v19 = vsub.f32 %v59_v15, %v64_v16 }
  0xbb   :  { %v61_v20 = vpop.xlane.xlu1 %60 }
  0xbc   :  { %v65_v21 = vmul.f32 %v63_v18, %v55_v17  ;;  %v68_v22 = vmul.f32 0.007874016, %v66_v19  ;;  %v93_v43 = vsub.f32 %v454_v1, %v63_v18 }
  0xbe   :  { %v70_v23 = vmax.f32 %v68_v22, 0.0  ;;  %v67_v24 = vsub.f32 %v61_v20, %v65_v21 }
  0xc0   :  { %306 = vrsqrt.f32 %v70_v23  ;;  %v69_v25 = vmul.f32 0.007874016, %v67_v24  ;;  %vm74_vm1 = vcmp.eq.f32.partialorder %v70_v23, inf  ;;  %v77_v29 = vand.u32 2147483648, %v70_v23 }
  0xc1   :  { %vm76_vm2 = vcmp.eq.f32.partialorder %v70_v23, 0.0 }
  0xc2   :  { %v71_v26 = vmax.f32 %v69_v25, 0.0 }
  0xc4   :  { %308 = vrsqrt.f32 %v71_v26  ;;  %vm81_vm3 = vcmp.eq.f32.partialorder %v71_v26, inf  ;;  %v84_v35 = vand.u32 2147483648, %v71_v26  ;;  %vm83_vm4 = vcmp.eq.f32.partialorder %v71_v26, 0.0 }
  0xca   :  { %v307_v27 = vpop.eup %306 }
  0xcb   :  { %v73_v28 = vmul.f32 %v307_v27, %v70_v23 }
  0xcd   :  { %v75_v30 = vsel %vm74_vm1, %v70_v23, %v73_v28 }
  0xce   :  { %v78_v31 = vsel %vm76_vm2, %v77_v29, %v75_v30  ;;  %v309_v32 = vpop.eup %308 }
  0xcf   :  { %v86_v33 = vadd.f32 1e-06, %v78_v31  ;;  %v80_v34 = vmul.f32 %v309_v32, %v71_v26 }
  0xd1   :  { %310 = vrcp.f32 %v86_v33  ;;  %v82_v36 = vsel %vm81_vm3, %v71_v26, %v80_v34 }
  0xd2   :  { %v85_v37 = vsel %vm83_vm4, %v84_v35, %v82_v36 }
  0xd3   :  { %v87_v38 = vadd.f32 1e-06, %v85_v37 }
  0xd5   :  { %312 = vrcp.f32 %v87_v38 }
  0xdb   :  { %v311_v39 = vpop.eup %310 }
  0xdc   :  { %v94_v41 = vmul.f32 %v311_v39, %v92_v40 }
  0xde   :  { %v102_v46 = vmul.f32 %v249_v42, %v94_v41 }
  0xdf   :  { %v313_v44 = vpop.eup %312 }
  0xe0   :  { %v95_v45 = vmul.f32 %v313_v44, %v93_v43  ;;  %v110_v49 = vadd.f32 %v250_v47, %v102_v46 }
  0xe2   :  { %v103_v48 = vmul.f32 %v249_v42, %v95_v45 }
  0xe4   :  { %v111_v50 = vadd.f32 %v250_v47, %v103_v48 }
  0xe6   :  { %v112_v51 = vpack.c.bf16 %v111_v50, %v110_v49 }
  0xe8   :  { %286 = vmatmul.mubr.bf16.vlgmr.msra.gmra.mrb[0].mxu0 %v112_v51 }
 0x1bb   :  { %v211_v55 = vpop.f32.mrb[0].mxu0 }
 0x1bc   :  { %v227_v56 = vadd.f32 %v225_v53, %v211_v55  ;;  %v287_v57 = vpop.f32.mrb[1].mxu0 }
 0x1bd   :  { %v214_v58 = vpop.f32.mrb[2].mxu0 }
 0x1be   :  { %229 = vst [vmem:[#allocation7] sm:$0xff] %v227_v56  ;;  %v228_v59 = vadd.f32 %v226_v54, %v214_v58  ;;  %v288_v60 = vpop.f32.mrb[3].mxu0 }
 0x1c0   :  { %230 = vst [vmem:[#allocation7 + $0x8] sm:$0xff] %v228_v59 }
 0x1c1   :  { %369 = shalt.err (!%p366_p6)
}
 0x1c2   :  { %s370_s27 = scalar_lea.hbm %s495_s5, 256 }
 0x1c3   :  { %p371_p7 = scmp.ne.s32.totalorder %s495_s5, %s370_s27  ;;  %p374_p8 = scmp.lt.u32.totalorder %s370_s27, %s495_s5 }
 0x1c5   :  { %p376_p9 = pnand %p374_p8, %p371_p7 }
 0x1c7   :  { %379 = shalt.err (!%p376_p9)
}
 0x1c8   :  { %242 = dma.vmem_to_hbm [thread:$0]  %s237_s25, 256, %s495_s5, [#allocation4], %s387_s28, %s387_s28, %s388_s29  }
 0x1c9   :  { %384 = dma.done.wait [#allocation4], 256  }
 0x1ca   :  { %385 = vsyncadd [#allocation4], 4294967040 }
 0x1cb   :  { %246 = vsyncpa [#allocation3], 1 }
 0x1cc   :  { %247 = vsyncpa [#allocation6], 1 }
 0x1cd   :  { %248 = vsyncpa [#allocation4], 1 }

</bundles_post_ra>
